<compile_context>
chip_gen: v6e
topology: v6e:2x2x1
jax: 0.10.0
libtpu: 0.0.40
codegen_flags: <defaults>
</compile_context>

<pallas_src>
from functools import partial

import numpy as np
import jax
import jax.numpy as jnp
from jax import lax
from jax.experimental import pallas as pl
from jax.experimental.pallas import tpu as pltpu


def _backproject_kernel(kinv_ref, depth_ref, out_ref, *, img_w: int, flat: bool):
    """One grid step: one batch element x one row-band of the (R, C) pixel view.

    kinv_ref : (b, 16)         SMEM - flattened per-batch inverse intrinsics
    depth_ref: (1, TR, C)      VMEM - depth tile
    out_ref  : (1, 4, TR, C)   VMEM - output tile, rows (x, y, z, 1)
    """
    bi = pl.program_id(0)            # batch index
    ti = pl.program_id(1)            # row-band index within the (R, C) view
    tr = depth_ref.shape[1]
    c = depth_ref.shape[2]

    row = ti * tr + lax.broadcasted_iota(jnp.int32, (tr, c), 0)
    col = lax.broadcasted_iota(jnp.int32, (tr, c), 1)

    if flat:
        # Pixel axis was flattened to lanes of 128: p = row*C + col.
        # Recover (x, y) = (p % w, p // w) without a vector integer divide:
        # float reciprocal estimate + one exact integer correction step.
        # Exact for p < 2^24 (~16.7M pixels); the correction absorbs +/-1 slack.
        p = row * c + col
        y = jnp.floor(p.astype(jnp.float32) * jnp.float32(1.0 / img_w)).astype(jnp.int32)
        x = p - y * img_w
        hi = (x >= img_w).astype(jnp.int32)
        lo = (x < 0).astype(jnp.int32)
        y = y + hi - lo
        x = x - hi * img_w + lo * img_w
    else:
        # (R, C) == (h, w): row/col are already (y, x).
        x, y = col, row

    xf = x.astype(jnp.float32)
    yf = y.astype(jnp.float32)
    d = depth_ref[0].astype(jnp.float32)            # (TR, C)

    # rows 0..2: (K_inv[:3,:3] @ [x; y; 1]) * depth, scalar coefficients from SMEM.
    for i in range(3):
        k0 = kinv_ref[bi, 4 * i + 0]
        k1 = kinv_ref[bi, 4 * i + 1]
        k2 = kinv_ref[bi, 4 * i + 2]
        out_ref[0, i, :, :] = ((k0 * xf + k1 * yf + k2) * d).astype(out_ref.dtype)

    # row 3: homogeneous ones.
    out_ref[0, 3, :, :] = jnp.ones((tr, c), out_ref.dtype)


def _largest_row_tile(r: int, cap: int, sub: int) -> int:
    """Largest divisor of r that is <= cap and a multiple of `sub` (or == r)."""
    for t in range(min(cap, r), 0, -1):
        if r % t == 0 and (t % sub == 0 or t == r):
            return t
    # Pathological (e.g. prime r > cap): single block covering all rows.
    return r


def backproject_depth(depth: jax.Array, k_inv: jax.Array,
                      *, tile_pixels_target: int = 256 * 1024) -> jax.Array:
    """depth: (b, 1, h, w), k_inv: (b, 4, 4) -> (b, 4, h*w)."""
    b, _, h, w = depth.shape
    n = h * w
    itemsize = jnp.dtype(depth.dtype).itemsize
    sub = {4: 8, 2: 16, 1: 32}.get(itemsize, 8)      # sublane packing per dtype

    # Pick the pixel view: lane-dense (R, 128) when possible, else raw (h, w).
    if n % 128 == 0:
        r_dim, c_dim, flat = n // 128, 128, True
    else:
        r_dim, c_dim, flat = h, w, False

    # Row tile: divides r_dim exactly (no pad/slice), ~tile_pixels_target pixels.
    cap_rows = max(1, tile_pixels_target // c_dim)
    tr = _largest_row_tile(r_dim, cap_rows, sub)
    n_tiles = r_dim // tr

    # v7x megacore: prefer an even total step count when it costs ~nothing.
    if (b * n_tiles) % 2 == 1 and tr % (2 * sub) == 0 and (tr // 2) * c_dim >= 32768:
        tr //= 2
        n_tiles = r_dim // tr

    depth_view = depth.reshape(b, r_dim, c_dim)                 # contiguous, free
    kinv_flat = k_inv.astype(jnp.float32).reshape(b, 16)        # SMEM-friendly

    # VMEM budget: double-buffered depth + output blocks, plus an estimate of
    # the full-tile f32 temporaries (iota / x / y / products) the body holds.
    block_bytes = (1 + 4) * tr * c_dim * itemsize
    tmp_bytes = 12 * tr * c_dim * 4
    vmem_limit = max(int(1.3 * (2 * block_bytes + tmp_bytes)), 4 << 20)

    kernel = partial(_backproject_kernel, img_w=w, flat=flat)

    out = pl.pallas_call(
        kernel,
        out_shape=jax.ShapeDtypeStruct((b, 4, r_dim, c_dim), depth.dtype),
        grid=(b, n_tiles),
        in_specs=[
            pl.BlockSpec(memory_space=pltpu.MemorySpace.SMEM),                 # K_inv (whole)
            pl.BlockSpec((1, tr, c_dim), lambda bi, ti: (bi, ti, 0)),          # depth tile
        ],
        out_specs=pl.BlockSpec((1, 4, tr, c_dim), lambda bi, ti: (bi, 0, ti, 0)),
        compiler_params=pltpu.CompilerParams(
            dimension_semantics=("parallel", "parallel"),
            vmem_limit_bytes=int(vmem_limit),
        ),
    )(kinv_flat, depth_view)

    return out.reshape(b, 4, n)                                  # contiguous, free


# ----------------------------- reference / test -----------------------------

def make_pix(h: int, w: int, dtype=jnp.float32):
    """PyTorch buffer equivalent: meshgrid(indexing='xy') + ones row -> (3, h*w)."""
    xs, ys = np.meshgrid(np.arange(w), np.arange(h), indexing="xy")
    pix = np.stack([xs, ys]).reshape(2, -1).astype(np.float32)
    pix = np.concatenate([pix, np.ones((1, h * w), np.float32)], 0)
    return jnp.asarray(pix, dtype=dtype)


def _reference(depth, k_inv):
    b, _, h, w = depth.shape
    pix = make_pix(h, w, depth.dtype)
    pts = jnp.einsum("bij,jn->bin", k_inv[:, :3, :3], pix)       # (b, 3, h*w)
    pts = pts * depth.reshape(b, 1, h * w)
    ones = jnp.ones((b, 1, h * w), depth.dtype)
    return jnp.concatenate([pts, ones], axis=1)                  # (b, 4, h*w)


def _run_case(key, b, h, w):
    k_d, k_k = jax.random.split(key)
    depth = jax.random.uniform(k_d, (b, 1, h, w), jnp.float32, 0.1, 10.0)
    k_inv = (jax.random.normal(k_k, (b, 4, 4), jnp.float32) * 0.1
             + jnp.eye(4, dtype=jnp.float32)[None])
    out = jax.block_until_ready(backproject_depth(depth, k_inv))
    ref = _reference(depth, k_inv)
    assert out.shape == (b, 4, h * w), out.shape
    np.testing.assert_allclose(np.asarray(out), np.asarray(ref), rtol=1e-5, atol=1e-5)


if __name__ == "__main__":
    key = jax.random.PRNGKey(0)
    k1, k2 = jax.random.split(key)

    # Case 1: h*w % 128 == 0 -> lane-dense flattened (R, 128) path.
    _run_case(k1, b=2, h=16, w=16)

    # Case 2: h*w % 128 != 0 -> un-padded (h, w) row-band fallback path.
    _run_case(k2, b=2, h=8, w=20)

    print("KERNEL_OK")
</pallas_src>

<mosaic_0001>
module attributes {stable_mosaic.version = 11 : i64} {
  func.func @_backproject_kernel(%arg0: i32, %arg1: i32, %arg2: memref<2x16xf32, #tpu.memory_space<smem>>, %arg3: memref<1x2x128xf32, #tpu.memory_space<vmem>>, %arg4: memref<1x4x2x128xf32, #tpu.memory_space<vmem>>) attributes {dimension_semantics = [#tpu.dimension_semantics<parallel>, #tpu.dimension_semantics<parallel>], iteration_bounds = array<i64: 2, 1>, scalar_prefetch = 0 : i64, scratch_operands = 0 : i64, tpu.core_type = #tpu.core_type<tc>, window_params = [{transform_indices = @transform_0, window_bounds = array<i64: 2, 16>}, {transform_indices = @transform_1, window_bounds = array<i64: 1, 2, 128>}, {transform_indices = @transform_2, window_bounds = array<i64: 1, 4, 2, 128>}]} {
    %c2_i32 = arith.constant 2 : i32
    %0 = arith.muli %arg1, %c2_i32 : i32
    %1 = tpu.iota {dimensions = array<i32: 0>} : vector<2x128xi32>
    %2 = vector.broadcast %0 : i32 to vector<2x128xi32>
    %3 = arith.addi %2, %1 : vector<2x128xi32>
    %4 = tpu.iota {dimensions = array<i32: 1>} : vector<2x128xi32>
    %c128_i32 = arith.constant 128 : i32
    %5 = vector.broadcast %c128_i32 : i32 to vector<2x128xi32>
    %6 = arith.muli %3, %5 : vector<2x128xi32>
    %7 = arith.addi %6, %4 : vector<2x128xi32>
    %8 = arith.sitofp %7 : vector<2x128xi32> to vector<2x128xf32>
    %cst = arith.constant 6.250000e-02 : f32
    %9 = vector.broadcast %cst : f32 to vector<2x128xf32>
    %10 = arith.mulf %8, %9 : vector<2x128xf32>
    %11 = math.floor %10 : vector<2x128xf32>
    %12 = arith.fptosi %11 : vector<2x128xf32> to vector<2x128xi32>
    %c16_i32 = arith.constant 16 : i32
    %13 = vector.broadcast %c16_i32 : i32 to vector<2x128xi32>
    %14 = arith.muli %12, %13 : vector<2x128xi32>
    %15 = arith.subi %7, %14 : vector<2x128xi32>
    %c16_i32_0 = arith.constant 16 : i32
    %16 = vector.broadcast %c16_i32_0 : i32 to vector<2x128xi32>
    %17 = arith.cmpi sge, %15, %16 : vector<2x128xi32>
    %18 = arith.extui %17 : vector<2x128xi1> to vector<2x128xi32>
    %c0_i32 = arith.constant 0 : i32
    %19 = vector.broadcast %c0_i32 : i32 to vector<2x128xi32>
    %20 = arith.cmpi slt, %15, %19 : vector<2x128xi32>
    %21 = arith.extui %20 : vector<2x128xi1> to vector<2x128xi32>
    %22 = arith.addi %12, %18 : vector<2x128xi32>
    %23 = arith.subi %22, %21 : vector<2x128xi32>
    %c16_i32_1 = arith.constant 16 : i32
    %24 = vector.broadcast %c16_i32_1 : i32 to vector<2x128xi32>
    %25 = arith.muli %18, %24 : vector<2x128xi32>
    %26 = arith.subi %15, %25 : vector<2x128xi32>
    %c16_i32_2 = arith.constant 16 : i32
    %27 = vector.broadcast %c16_i32_2 : i32 to vector<2x128xi32>
    %28 = arith.muli %21, %27 : vector<2x128xi32>
    %29 = arith.addi %26, %28 : vector<2x128xi32>
    %30 = arith.sitofp %29 : vector<2x128xi32> to vector<2x128xf32>
    %31 = arith.sitofp %23 : vector<2x128xi32> to vector<2x128xf32>
    %c0 = arith.constant 0 : index
    %c0_3 = arith.constant 0 : index
    %c0_4 = arith.constant 0 : index
    %32 = vector.load %arg3[%c0, %c0_3, %c0_4] : memref<1x2x128xf32, #tpu.memory_space<vmem>>, vector<1x2x128xf32>
    %33 = vector.shape_cast %32 : vector<1x2x128xf32> to vector<2x128xf32>
    %34 = arith.index_cast %arg0 : i32 to index
    %c0_5 = arith.constant 0 : index
    %35 = memref.load %arg2[%34, %c0_5] : memref<2x16xf32, #tpu.memory_space<smem>>
    %36 = arith.index_cast %arg0 : i32 to index
    %c1 = arith.constant 1 : index
    %37 = memref.load %arg2[%36, %c1] : memref<2x16xf32, #tpu.memory_space<smem>>
    %38 = arith.index_cast %arg0 : i32 to index
    %c2 = arith.constant 2 : index
    %39 = memref.load %arg2[%38, %c2] : memref<2x16xf32, #tpu.memory_space<smem>>
    %40 = vector.broadcast %35 : f32 to vector<2x128xf32>
    %41 = arith.mulf %40, %30 : vector<2x128xf32>
    %42 = vector.broadcast %37 : f32 to vector<2x128xf32>
    %43 = arith.mulf %42, %31 : vector<2x128xf32>
    %44 = arith.addf %41, %43 : vector<2x128xf32>
    %45 = vector.broadcast %39 : f32 to vector<2x128xf32>
    %46 = arith.addf %44, %45 : vector<2x128xf32>
    %47 = arith.mulf %46, %33 : vector<2x128xf32>
    %c0_6 = arith.constant 0 : index
    %c0_7 = arith.constant 0 : index
    %c0_8 = arith.constant 0 : index
    %c0_9 = arith.constant 0 : index
    %48 = vector.load %arg4[%c0_6, %c0_7, %c0_8, %c0_9] : memref<1x4x2x128xf32, #tpu.memory_space<vmem>>, vector<1x1x2x128xf32>
    %49 = vector.shape_cast %48 : vector<1x1x2x128xf32> to vector<2x128xf32>
    %50 = vector.shape_cast %47 : vector<2x128xf32> to vector<1x1x2x128xf32>
    tpu.vector_store %arg4[%c0_6, %c0_7, %c0_8, %c0_9], %50 {strides = array<i32>} : memref<1x4x2x128xf32, #tpu.memory_space<vmem>>, vector<1x1x2x128xf32>,
    %51 = arith.index_cast %arg0 : i32 to index
    %c4 = arith.constant 4 : index
    %52 = memref.load %arg2[%51, %c4] : memref<2x16xf32, #tpu.memory_space<smem>>
    %53 = arith.index_cast %arg0 : i32 to index
    %c5 = arith.constant 5 : index
    %54 = memref.load %arg2[%53, %c5] : memref<2x16xf32, #tpu.memory_space<smem>>
    %55 = arith.index_cast %arg0 : i32 to index
    %c6 = arith.constant 6 : index
    %56 = memref.load %arg2[%55, %c6] : memref<2x16xf32, #tpu.memory_space<smem>>
    %57 = vector.broadcast %52 : f32 to vector<2x128xf32>
    %58 = arith.mulf %57, %30 : vector<2x128xf32>
    %59 = vector.broadcast %54 : f32 to vector<2x128xf32>
    %60 = arith.mulf %59, %31 : vector<2x128xf32>
    %61 = arith.addf %58, %60 : vector<2x128xf32>
    %62 = vector.broadcast %56 : f32 to vector<2x128xf32>
    %63 = arith.addf %61, %62 : vector<2x128xf32>
    %64 = arith.mulf %63, %33 : vector<2x128xf32>
    %c0_10 = arith.constant 0 : index
    %c1_11 = arith.constant 1 : index
    %c0_12 = arith.constant 0 : index
    %c0_13 = arith.constant 0 : index
    %65 = vector.load %arg4[%c0_10, %c1_11, %c0_12, %c0_13] : memref<1x4x2x128xf32, #tpu.memory_space<vmem>>, vector<1x1x2x128xf32>
    %66 = vector.shape_cast %65 : vector<1x1x2x128xf32> to vector<2x128xf32>
    %67 = vector.shape_cast %64 : vector<2x128xf32> to vector<1x1x2x128xf32>
    tpu.vector_store %arg4[%c0_10, %c1_11, %c0_12, %c0_13], %67 {strides = array<i32>} : memref<1x4x2x128xf32, #tpu.memory_space<vmem>>, vector<1x1x2x128xf32>,
    %68 = arith.index_cast %arg0 : i32 to index
    %c8 = arith.constant 8 : index
    %69 = memref.load %arg2[%68, %c8] : memref<2x16xf32, #tpu.memory_space<smem>>
    %70 = arith.index_cast %arg0 : i32 to index
    %c9 = arith.constant 9 : index
    %71 = memref.load %arg2[%70, %c9] : memref<2x16xf32, #tpu.memory_space<smem>>
    %72 = arith.index_cast %arg0 : i32 to index
    %c10 = arith.constant 10 : index
    %73 = memref.load %arg2[%72, %c10] : memref<2x16xf32, #tpu.memory_space<smem>>
    %74 = vector.broadcast %69 : f32 to vector<2x128xf32>
    %75 = arith.mulf %74, %30 : vector<2x128xf32>
    %76 = vector.broadcast %71 : f32 to vector<2x128xf32>
    %77 = arith.mulf %76, %31 : vector<2x128xf32>
    %78 = arith.addf %75, %77 : vector<2x128xf32>
    %79 = vector.broadcast %73 : f32 to vector<2x128xf32>
    %80 = arith.addf %78, %79 : vector<2x128xf32>
    %81 = arith.mulf %80, %33 : vector<2x128xf32>
    %c0_14 = arith.constant 0 : index
    %c2_15 = arith.constant 2 : index
    %c0_16 = arith.constant 0 : index
    %c0_17 = arith.constant 0 : index
    %82 = vector.load %arg4[%c0_14, %c2_15, %c0_16, %c0_17] : memref<1x4x2x128xf32, #tpu.memory_space<vmem>>, vector<1x1x2x128xf32>
    %83 = vector.shape_cast %82 : vector<1x1x2x128xf32> to vector<2x128xf32>
    %84 = vector.shape_cast %81 : vector<2x128xf32> to vector<1x1x2x128xf32>
    tpu.vector_store %arg4[%c0_14, %c2_15, %c0_16, %c0_17], %84 {strides = array<i32>} : memref<1x4x2x128xf32, #tpu.memory_space<vmem>>, vector<1x1x2x128xf32>,
    %cst_18 = arith.constant 1.000000e+00 : f32
    %85 = vector.broadcast %cst_18 : f32 to vector<2x128xf32>
    %c0_19 = arith.constant 0 : index
    %c3 = arith.constant 3 : index
    %c0_20 = arith.constant 0 : index
    %c0_21 = arith.constant 0 : index
    %86 = vector.load %arg4[%c0_19, %c3, %c0_20, %c0_21] : memref<1x4x2x128xf32, #tpu.memory_space<vmem>>, vector<1x1x2x128xf32>
    %87 = vector.shape_cast %86 : vector<1x1x2x128xf32> to vector<2x128xf32>
    %88 = vector.shape_cast %85 : vector<2x128xf32> to vector<1x1x2x128xf32>
    tpu.vector_store %arg4[%c0_19, %c3, %c0_20, %c0_21], %88 {strides = array<i32>} : memref<1x4x2x128xf32, #tpu.memory_space<vmem>>, vector<1x1x2x128xf32>,
    return
  }
  func.func @transform_0(%arg0: i32, %arg1: i32) -> (i32, i32) {
    %c0_i32 = arith.constant 0 : i32
    %c0_i32_0 = arith.constant 0 : i32
    %c0_i32_1 = arith.constant 0 : i32
    return %c0_i32, %c0_i32_0 : i32, i32
  }
  func.func @transform_1(%arg0: i32, %arg1: i32) -> (i32, i32, i32) {
    %c0_i32 = arith.constant 0 : i32
    %c0_i32_0 = arith.constant 0 : i32
    return %arg0, %arg1, %c0_i32 : i32, i32, i32
  }
  func.func @transform_2(%arg0: i32, %arg1: i32) -> (i32, i32, i32, i32) {
    %c0_i32 = arith.constant 0 : i32
    %c0_i32_0 = arith.constant 0 : i32
    %c0_i32_1 = arith.constant 0 : i32
    return %arg0, %c0_i32, %arg1, %c0_i32_0 : i32, i32, i32, i32
  }
}

</mosaic_0001>

<bundles_post_ra>
// kernel: tpu_custom_call.1
= control target key start
LH: loop header
LB: loop body
LE: loop exit
PB: predicated region body
PF: predicated region fallthrough
CT: control target
= control target key end

     0   :  { %7 = vsyncpa [#allocation5], 0  ;;  %s834_s0 = inlined_call_operand.hbm [shape: f32[2,16], index: 0, kind: input, shape index: {}]   ;;  %s835_s1 = inlined_call_operand.hbm [shape: f32[2,2,128], index: 1, kind: input, shape index: {}]   ;;  %s836_s2 = inlined_call_operand.hbm [shape: f32[2,4,2,128], index: 2, kind: output, shape index: {}]  }
   0x1   :  { %8 = vsyncpa [#allocation3], 0 }
   0x2   :  { %10 = vsyncpa [#allocation3 + $0x1], 0 }
   0x3   :  { %11 = vsyncpa [#allocation4], 0 }
   0x4   :  { %13 = vsyncpa [#allocation4 + $0x1], 0  ;;  %s623_s9 = smov 0   ;;  %s625_s10 = smov 0  }
   0x5   :  { %s627_s11 = smov 0   ;;  %s629_s12 = smov 0  }
   0x6   :  { %s631_s13 = smov 0   ;;  %s633_s14 = smov 0  }
   0x7 LB: > { %s376_s15 = sadd.s32 4294967295, %s599_s14   ;;  %s377_s16 = sadd.s32 4294967294, %s599_s14   ;;  %s599_s14 = sphi %s633_s14, %s19_s14   ;;  %s595_s13 = sphi %s631_s13, %s853_s13   ;;  %s591_s12 = sphi %s629_s12, %s852_s12   ;;  %s587_s11 = sphi %s627_s11, %s851_s11   ;;  %s583_s10 = sphi %s625_s10, %s850_s10   ;;  %s579_s9 = sphi %s623_s9, %s849_s9  }
   0x8   : > { %p74_p0 = scmp.ne.s32.totalorder %s583_s10, %s579_s9  ;;  %p657_p1 = scmp.eq.s32.totalorder %s376_s15, 0 }
   0x9   : > { %p661_p2 = scmp.eq.s32.totalorder %s376_s15, 1  ;;  %p106_p3 = scmp.eq.s32.totalorder %s377_s16, 1 }
   0xa   : > { %p667_p4 = por %p657_p1, %p74_p0  ;;  %p378_p5 = scmp.ge.s32.totalorder %s599_s14, 1 }
   0xb   : > { %p672_p6 = por %p106_p3, %p74_p0  ;;  %p113_p7 = scmp.lt.s32.totalorder %s599_s14, 3 }
   0xc   : > { %s31_s22 = sadd.s32 1, %s595_s13  ;;  %s61_s23 = sadd.s32 1, %s587_s11 }
   0xd   : > { %s841_s20 = scalar_select %p672_p6, 1, 0 }
   0xe   : > { %p677_p8 = pnand %p378_p5, %p113_p7  ;;  %p33_p12 = scmp.ge.s32.totalorder %s31_s22, 2 }
   0xf   : > { %p68_p13 = scmp.ne.s32.totalorder %s587_s11, %s583_s10  ;;  %p69_p0 = scmp.eq.s32.totalorder %s599_s14, 0 }
  0x10   : > { %p407_p10 = pneg %p677_p8  ;;  %s601_s24 = smov [#allocation2]  }
  0x11   : > { %s855_s22 = smov (%p33_p12, %s31_s22), 0  ;;  %p696_p3 = por %p69_p0, %p68_p13 }
  0x12   : > { %p408_p11 = pnand %p407_p10, %p657_p1  ;;  %p702_p5 = por %p661_p2, %p68_p13 }
  0x13   : > { %s56_s29 = ssub.s32 %s595_s13, %s855_s22  ;;  %p420_p7 = scmp.lt.s32.totalorder %s599_s14, 2 }
  0x14   : > { %410 = dma.hbm_to_smem (!%p408_p11), %s834_s0, 32, %s601_s24, [#allocation5]  }
  0x15   : > { %s844_s28 = scalar_select %p702_p5, 1, 0 }
  0x16   : > { %p59_p10 = scmp.eq.s32.totalorder %s56_s29, 0  ;;  %s135_s30 = sand.u32 1, %s587_s11  }
  0x17   : > { %s381_s3 = sshll.u32 %s135_s30, 1  ;;  %s382_s5 = sshll.u32 %s595_s13, 5 }
  0x18   : > { %s711_s4 = scalar_select %p59_p10, %s587_s11, %s61_s23  }
  0x19   : > { %s145_s8 = scalar_lea.hbm %s835_s1, %s382_s5  ;;  %s139_s15 = scalar_lea.vmem [#allocation6], %s381_s3 }
  0x1a   : > { %s147_s16 = sshll.u32 %s139_s15, 4  ;;  %p719_p2 = pnand %p420_p7, %p696_p3  ;;  %s148_s16 = int_to_ptr.vmem [resolvable:$true] %s147_s16 }
  0x1b   : > { %s136_s24 = scalar_lea.sflag [#allocation3], %s135_s30  ;;  %s500_s25 = scalar_lea.vmem %s148_s16, 32 }
  0x1c   : > { %p489_p11 = pneg %p719_p2  ;;  %p501_p12 = scmp.ne.s32.totalorder %s148_s16, %s500_s25 }
  0x1d   : > { %s602_s23 = smov [#allocation6]  }
  0x1e   : > { %p503_p13 = pnand %p501_p12, %p489_p11  ;;  %s505_s26 = sshll.u32 %s602_s23, 4  ;;  %s506_s26 = int_to_ptr.vmem [resolvable:$false] %s505_s26 }
  0x1f   : > { %s507_s29 = scalar_lea.vmem %s506_s26, 64  ;;  %p508_p10 = scmp.lt.s32.totalorder %s148_s16, %s506_s26 }
  0x20   : > { %p504_p0 = pneg %p503_p13  ;;  %p509_p9 = scmp.lt.s32.totalorder %s507_s29, %s500_s25 }
  0x22   : > { %p510_p6 = por %p509_p9, %p508_p10 }
  0x24   : > { %p511_p5 = pnand %p510_p6, %p504_p0 }
  0x26   : > { %514 = shalt.err (!%p511_p5)
}
  0x27   : > { %414 = dma.hbm_to_vmem [thread:$0]  (!%p719_p2), %s145_s8, 32, %s148_s16, %s136_s24  }
  0x28   : > { %156 = sbr.rel (%p677_p8) target bundleno = 107 (0x6b), region = 28 }
  0x2d   : > { %566 = dma.done.wait (%p657_p1), [#allocation5], 32  }
  0x2e   : > { %568 = vsyncadd (%p657_p1), [#allocation5], 4294967264  ;;  %s734_s27 = sand.u32 1, %s583_s10  }
  0x2f   : > { %s385_s30 = sshll.u32 %s734_s27, 1  ;;  %s163_s3 = scalar_lea.sflag [#allocation3], %s734_s27 }
  0x30   : > { %s738_s5 = scalar_lea.vmem [#allocation6], %s385_s30 }
  0x31   : > { %570 = dma.done.wait (%p667_p4), %s163_s3, 32  }
  0x32   : > { %572 = vsyncadd (%p667_p4), %s163_s3, 4294967264 }
  0x33   : > { %171 = sfence }
  0x34   : > { %s386_s17 = sshll.u32 %s734_s27, 3  ;;  %v189_v0 = vlaneseq  ;;  %v603_v3 = vmov 1.0   ;;  %s749_s6 = sshll.u32 %s591_s12, 7  ;;  %v604_v13 = vmov 0   ;;  %v215_v42 = vld [vmem:[%s738_s5] sm:$0x3] }
  0x35   : > { %s745_s21 = scalar_lea.vmem [#allocation7], %s386_s17  ;;  %s218_s19 = sadd.s32 1, %s749_s6 }
  0x36   : > { %v190_v1 = vshrl.u32 %v189_v0, 7  ;;  %v194_v2 = vand.u32 127, %v189_v0  ;;  %390 = vst [vmem:[%s745_s21 + $0x6] sm:$0x3] %v603_v3  ;;  %s233_s7 = sadd.s32 5, %s749_s6  ;;  %s754_s8 = sld [smem:[#allocation2 + %s749_s6]] }
  0x37   : > { %s249_s15 = sadd.s32 9, %s749_s6  ;;  %s757_s16 = sld [smem:[#allocation2 + %s218_s19]] }
  0x38   : > { %v195_v4 = vmul.u32 128, %v190_v1  ;;  %s231_s12 = sadd.s32 4, %s749_s6  ;;  %s760_s18 = sld [smem:[#allocation2 + %s233_s7]] }
  0x39   : > { %s247_s24 = sadd.s32 8, %s749_s6  ;;  %s763_s25 = sld [smem:[#allocation2 + %s249_s15]] }
  0x3a   : > { %v196_v5 = vadd.s32 %v195_v4, %v194_v2  ;;  %s220_s23 = sadd.s32 2, %s749_s6  ;;  %s232_s26 = sld [smem:[#allocation2 + %s231_s12]] }
  0x3b   : > { %s235_s29 = sadd.s32 6, %s749_s6  ;;  %s248_s30 = sld [smem:[#allocation2 + %s247_s24]] }
  0x3c   : > { %v197_v6 = vcvt.s32.f32 %v196_v5  ;;  %s251_s3 = sadd.s32 10, %s749_s6  ;;  %s768_s17 = sld [smem:[#allocation2 + %s220_s23]]  ;;  %v222_v26 = vstv %s754_s8 }
  0x3d   : > { %s236_s19 = sld [smem:[#allocation2 + %s235_s29]]  ;;  %v224_v21 = vstv %s757_s16  ;;  %s280_s15 = sshll.u32 %s745_s21, 4  ;;  %s777_s15 = int_to_ptr.vmem [resolvable:$true] %s280_s15 }
  0x3e   : > { %v198_v7 = vmul.f32 0.0625, %v197_v6  ;;  %s252_s7 = sld [smem:[#allocation2 + %s251_s3]]  ;;  %v239_v22 = vstv %s760_s18  ;;  %s783_s12 = scalar_lea.hbm %s836_s2, %s749_s6 }
  0x3f   : > { %v255_v23 = vstv %s763_s25  ;;  %s266_s5 = scalar_lea.sflag [#allocation4], %s734_s27  ;;  %s515_s18 = scalar_lea.vmem %s777_s15, 128 }
  0x40   : > { %v199_v8 = vfloor.f32 %v198_v7  ;;  %v237_v27 = vstv %s232_s26  ;;  %p516_p1 = scmp.ne.s32.totalorder %s777_s15, %s515_s18  ;;  %p846_p4 = scmp.ne.s32.totalorder %s844_s28, 0 }
  0x41   : > { %v253_v28 = vstv %s248_s30  ;;  %s605_s24 = smov [#allocation7]  }
  0x42   : > { %v397_v9 = vtrunc.f32 %v199_v8  ;;  %v227_v36 = vstv %s768_s17  ;;  %p517_p6 = pnand %p516_p1, %p846_p4  ;;  %s519_s25 = sshll.u32 %s605_s24, 4  ;;  %s520_s25 = int_to_ptr.vmem [resolvable:$false] %s519_s25 }
  0x43   : > { %v242_v37 = vstv %s236_s19  ;;  %s521_s23 = scalar_lea.vmem %s520_s25, 256  ;;  %p522_p9 = scmp.lt.s32.totalorder %s777_s15, %s520_s25 }
  0x44   : > { %v398_v10 = vcvt.f32.s32 %v397_v9  ;;  %v258_v38 = vstv %s252_s7  ;;  %p518_p8 = pneg %p517_p6  ;;  %p523_p3 = scmp.lt.s32.totalorder %s521_s23, %s515_s18 }
  0x46   : > { %v201_v11 = vmul.u32 16, %v398_v10  ;;  %p524_p5 = por %p523_p3, %p522_p9 }
  0x48   : > { %v202_v12 = vsub.s32 %v196_v5, %v201_v11  ;;  %p525_p7 = pnand %p524_p5, %p518_p8 }
  0x4a   : > { %vm203_vm0 = vcmp.ge.s32.totalorder %v202_v12, 16  ;;  %vm205_vm1 = vcmp.lt.s32.totalorder %v202_v12, 0 }
  0x4b   : > { %v204_v14 = vsel %vm203_vm0, 1, %v604_v13  ;;  %v206_v15 = vsel %vm205_vm1, 1, %v604_v13 }
  0x4c   : > { %v207_v16 = vadd.s32 %v398_v10, %v204_v14  ;;  %v209_v17 = vmul.u32 16, %v204_v14  ;;  %v211_v18 = vmul.u32 16, %v206_v15 }
  0x4e   : > { %v208_v19 = vsub.s32 %v207_v16, %v206_v15  ;;  %v210_v20 = vsub.s32 %v202_v12, %v209_v17 }
  0x50   : > { %v212_v24 = vadd.s32 %v211_v18, %v210_v20  ;;  %v214_v25 = vcvt.s32.f32 %v208_v19 }
  0x52   : > { %v213_v29 = vcvt.s32.f32 %v212_v24  ;;  %v225_v30 = vmul.f32 %v224_v21, %v214_v25  ;;  %v240_v31 = vmul.f32 %v239_v22, %v214_v25  ;;  %v256_v32 = vmul.f32 %v255_v23, %v214_v25 }
  0x54   : > { %v223_v33 = vmul.f32 %v222_v26, %v213_v29  ;;  %v238_v34 = vmul.f32 %v237_v27, %v213_v29  ;;  %v254_v35 = vmul.f32 %v253_v28, %v213_v29 }
  0x56   : > { %v226_v39 = vadd.f32 %v225_v30, %v223_v33  ;;  %v241_v40 = vadd.f32 %v240_v31, %v238_v34  ;;  %v257_v41 = vadd.f32 %v256_v32, %v254_v35 }
  0x58   : > { %v228_v43 = vadd.f32 %v227_v36, %v226_v39  ;;  %v243_v44 = vadd.f32 %v242_v37, %v241_v40  ;;  %v259_v45 = vadd.f32 %v258_v38, %v257_v41 }
  0x5a   : > { %v229_v46 = vmul.f32 %v228_v43, %v215_v42  ;;  %v244_v47 = vmul.f32 %v243_v44, %v215_v42  ;;  %v260_v48 = vmul.f32 %v259_v45, %v215_v42 }
  0x5c   : > { %230 = vst [vmem:[%s745_s21] sm:$0x3] %v229_v46  ;;  %388 = vst [vmem:[%s745_s21 + $0x2] sm:$0x3] %v244_v47 }
  0x5d   : > { %389 = vst [vmem:[%s745_s21 + $0x4] sm:$0x3] %v260_v48 }
  0x5e   : > { %528 = shalt.err (!%p525_p7)
}
  0x5f   : > { %s529_s21 = scalar_lea.hbm %s783_s12, 128  ;;  %s533_s29 = scalar_lea.hbm %s836_s2, 256 }
  0x60   : > { %p530_p2 = scmp.ne.s32.totalorder %s783_s12, %s529_s21  ;;  %p534_p13 = scmp.lt.s32.totalorder %s783_s12, %s836_s2 }
  0x61   : > { %p535_p0 = scmp.lt.s32.totalorder %s533_s29, %s529_s21 }
  0x62   : > { %p531_p11 = pnand %p530_p2, %p846_p4 }
  0x63   : > { %p536_p10 = por %p535_p0, %p534_p13 }
  0x64   : > { %p532_p12 = pneg %p531_p11 }
  0x66   : > { %p537_p1 = pnand %p536_p10, %p532_p12 }
  0x68   : > { %540 = shalt.err (!%p537_p1)
}
  0x69   : > { %s606_s17 = smov 32   ;;  %s607_s19 = smov 2  }
  0x6a   : > { %405 = dma.vmem_to_hbm [thread:$0]  (%p846_p4), %s777_s15, 128, %s783_s12, %s266_s5, %s606_s17, %s606_s17, %s607_s19  }
  0x6b PF: > { %s295_s7 = sand.u32 1, %s579_s9   ;;  %p847_p6 = scmp.ne.s32.totalorder %s841_s20, 0 }
  0x6c   : > { %p848_p8 = scmp.ge.s32.totalorder %s599_s14, 2  ;;  %s296_s8 = scalar_lea.sflag [#allocation4], %s295_s7 }
  0x6e   : > { %p416_p9 = pnand %p848_p8, %p847_p6 }
  0x70   : > { %p417_p3 = pneg %p416_p9 }
  0x72   : > { %574 = dma.done.wait (%p417_p3), %s296_s8, 128  }
  0x73   : > { %576 = vsyncadd (%p417_p3), %s296_s8, 4294967168  ;;  %s19_s14 = sadd.s32 1, %s599_s14   ;;  %s849_s9 = smov %s583_s10 }
  0x74   : > { %p16_p5 = scmp.ge.s32.totalorder %s19_s14, 4   ;;  %s850_s10 = smov %s587_s11 }
  0x75   : > { %s851_s11 = smov %s711_s4  ;;  %s852_s12 = smov %s595_s13 }
  0x76   : > { %s853_s13 = smov %s855_s22  ;;  %18 = sbr.rel (!%p16_p5) target bundleno = 7 (0x7), region = 81 }
  0x7b   :  { %301 = vsyncpa [#allocation3], 1 }
  0x7c   :  { %303 = vsyncpa [#allocation3 + $0x1], 1 }
  0x7d   :  { %304 = vsyncpa [#allocation4], 1 }
  0x7e   :  { %306 = vsyncpa [#allocation4 + $0x1], 1 }
  0x7f   :  { %307 = vsyncpa [#allocation5], 1 }
  0x80   :  { %309 = vsyncpa [#allocation5 + $0x1], 1 }

</bundles_post_ra>
